<compile_context>
chip_gen: v7x
topology: tpu7x:2x2x1
jax: 0.10.0
libtpu: 0.0.40
codegen_flags: <defaults>
</compile_context>

<pallas_src>
import jax
import jax.numpy as jnp
import numpy as np
from jax.experimental import pallas as pl
from jax.experimental.pallas import tpu as pltpu

_SUBLANES = 8  # f32 sublane packing; kernel-1 output rows per class


# ----------------------------------------------------------------------------
# Kernel 1: streamed quadratic form  s_L = d @ CV_L @ d^T  (per class L)
# ----------------------------------------------------------------------------
def _sigma2_kernel(d_tile_ref, d_full_ref, cv_ref, out_ref, acc_ref):
    k = pl.program_id(1)

    @pl.when(k == 0)
    def _init():
        acc_ref[...] = jnp.zeros_like(acc_ref)

    # (1, TA) @ (TA, A) on the MXU; CV consumed in its native dtype,
    # accumulation forced to f32.
    d_tile = d_tile_ref[...].astype(cv_ref.dtype)
    partial = jnp.dot(d_tile, cv_ref[0], preferred_element_type=jnp.float32)  # (1, A)
    d_full = d_full_ref[...].astype(jnp.float32)                              # (1, A)
    acc_ref[...] += jnp.sum(partial * d_full, axis=1, keepdims=True)          # (1, 1)

    @pl.when(k == pl.num_programs(1) - 1)
    def _finalize():
        out_ref[...] = jnp.broadcast_to(acc_ref[...], out_ref.shape)


# ----------------------------------------------------------------------------
# Kernel 2: per-sample augmentation + weighted cross entropy (lane-dense (C, N))
# ----------------------------------------------------------------------------
def _ce_kernel(params_ref, sig_ref, yT_ref, labels_ref, loss_ref):
    C, N = yT_ref.shape
    half_ratio = 0.5 * params_ref[0]
    cew0 = params_ref[1]
    cew1 = params_ref[2]
    s0 = sig_ref[0, 0]               # d @ CV_0 @ d^T
    s1 = sig_ref[_SUBLANES, 0]       # d @ CV_1 @ d^T

    labels = labels_ref[...]                                         # (1, N) int32
    row_ids = jax.lax.broadcasted_iota(jnp.int32, (C, N), 0)         # (C, N)
    is_lab0 = labels == 0                                            # (1, N)

    # ISDA sigma2 for class_num = 2: sigma2[n, k] = 0 if k == label_n else s_{label_n}
    s_lab = jnp.where(is_lab0, s0, s1)                               # (1, N)
    sigma2_t = jnp.where(row_ids == labels, 0.0, s_lab)              # (C, N)

    aug = yT_ref[...].astype(jnp.float32) + half_ratio * sigma2_t    # (C, N)
    mx = jnp.max(aug, axis=0, keepdims=True)                         # (1, N)
    lse = jnp.log(jnp.sum(jnp.exp(aug - mx), axis=0, keepdims=True)) + mx
    logit_y = jnp.sum(jnp.where(row_ids == labels, aug, 0.0), axis=0, keepdims=True)
    w_n = jnp.where(is_lab0, cew0, cew1)                             # (1, N)

    num = jnp.sum(w_n * (lse - logit_y), keepdims=True)              # (1, 1)
    den = jnp.sum(w_n, keepdims=True)                                # (1, 1)
    loss_ref[...] = num / den


# ----------------------------------------------------------------------------
# Wrapper
# ----------------------------------------------------------------------------
def sacofa_loss(fc_weight, features, y, target, covariance, ratio, ce_class_weight,
                *, tile_a=512):
    """Pallas equivalent of SACoFALoss.forward(fc, features, y, target, CoVariance, ratio)."""
    del features  # the reference module only uses `features` for its shape
    N, C = y.shape
    Cw, A = fc_weight.shape
    assert C == 2 and Cw == 2 and covariance.shape == (C, A, A), (
        "class_num = 2 is implied by the module's CE class weights [1.0, 0.5]")

    # CV row-tile size: must divide A and keep the d-tile lane-aligned (x128).
    TA = min(tile_a, A)
    if TA % 128 != 0 or A % TA != 0:
        TA = A
    KT = A // TA

    # Only non-zero ISDA diff row for C = 2 (sign irrelevant for the quadratic form).
    d = (fc_weight[0:1, :] - fc_weight[1:2, :]).astype(jnp.float32)   # (1, A)

    itemsize = jnp.dtype(covariance.dtype).itemsize
    cv_tile_bytes = TA * A * itemsize
    # Double-buffered CV tiles + resident d/out/scratch + headroom; stays well
    # below v7x's 64 MiB physical VMEM.
    vmem_bytes = int(min(max(4 * cv_tile_bytes + (2 << 20), 32 << 20), 56 << 20))

    sigma2 = pl.pallas_call(
        _sigma2_kernel,
        out_shape=jax.ShapeDtypeStruct((C * _SUBLANES, 128), jnp.float32),
        grid_spec=pltpu.PrefetchScalarGridSpec(
            num_scalar_prefetch=0,
            grid=(C, KT),
            in_specs=[
                pl.BlockSpec((1, TA), lambda c, k: (0, k)),         # d, A-tile
                pl.BlockSpec((1, A), lambda c, k: (0, 0)),          # d, resident
                pl.BlockSpec((1, TA, A), lambda c, k: (c, k, 0)),   # CV row tile
            ],
            out_specs=pl.BlockSpec((_SUBLANES, 128), lambda c, k: (c, 0)),
            scratch_shapes=[pltpu.VMEM((1, 1), jnp.float32)],
        ),
        compiler_params=pltpu.CompilerParams(
            dimension_semantics=("parallel", "arbitrary"),
            vmem_limit_bytes=vmem_bytes),
        cost_estimate=pl.CostEstimate(
            flops=2 * C * A * A + 4 * C * A,
            transcendentals=0,
            bytes_accessed=C * A * A * itemsize + 2 * A * 4 + C * _SUBLANES * 128 * 4),
    )(d, d, covariance)

    # --- tiny weighted-CE epilogue (lane-dense (C, N) layout) ----------------
    params = jnp.concatenate([
        jnp.asarray([ratio], jnp.float32),
        jnp.asarray(ce_class_weight, jnp.float32).reshape(C)])        # [ratio, w0, w1]
    labels2d = target.astype(jnp.int32).reshape(1, N)
    y_t = jnp.transpose(y).astype(jnp.float32)                        # (C, N)

    loss = pl.pallas_call(
        _ce_kernel,
        out_shape=jax.ShapeDtypeStruct((1, 1), jnp.float32),
        in_specs=[
            pl.BlockSpec(memory_space=pltpu.MemorySpace.SMEM),   # [ratio, w0, w1]
            pl.BlockSpec(memory_space=pltpu.MemorySpace.SMEM),   # sigma2 table
            pl.BlockSpec(memory_space=pltpu.MemorySpace.VMEM),   # y^T (C, N)
            pl.BlockSpec(memory_space=pltpu.MemorySpace.VMEM),   # labels (1, N)
        ],
        out_specs=pl.BlockSpec(memory_space=pltpu.MemorySpace.VMEM),
        cost_estimate=pl.CostEstimate(
            flops=12 * N * C,
            transcendentals=N * (C + 1),
            bytes_accessed=(N * C + N + C * _SUBLANES * 128 + 4) * 4),
    )(params, sigma2, y_t, labels2d)
    return loss[0, 0]


def sacofa_loss_ref(fc_weight, features, y, target, covariance, ratio, ce_class_weight):
    """Pure-JAX reference (mirrors the PyTorch forward)."""
    del features
    w = fc_weight                                     # (C, A)
    w_y = w[target]                                   # (N, A)
    diff = w[None, :, :] - w_y[:, None, :]            # (N, C, A)
    cv = covariance[target]                           # (N, A, A)
    sigma2 = jnp.einsum('nca,nab,ncb->nc', diff, cv, diff,
                        precision=jax.lax.Precision.HIGHEST)
    aug = y + 0.5 * ratio * sigma2
    logp = jax.nn.log_softmax(aug, axis=1)
    per = -jnp.take_along_axis(logp, target[:, None], axis=1)[:, 0]
    wn = ce_class_weight[target]
    return jnp.sum(wn * per) / jnp.sum(wn)


if __name__ == "__main__":
    key = jax.random.PRNGKey(0)
    N, C, A = 8, 2, 256   # class_num = 2 is implied by the module's CE weights [1.0, 0.5]
    k1, k2, k3, k4, k5 = jax.random.split(key, 5)

    fc_weight = jax.random.normal(k1, (C, A), jnp.float32) * 0.1    # nn.Linear(A, C).weight
    features = jax.random.normal(k2, (N, A), jnp.float32)
    y = jax.random.normal(k3, (N, C), jnp.float32)                  # logits fc(features)-style
    target = jax.random.randint(k4, (N,), 0, C, jnp.int32)
    b = jax.random.normal(k5, (C, A, A), jnp.float32) * 0.05
    covariance = jnp.einsum('cik,cjk->cij', b, b)                   # symmetric PSD per class
    ratio = 0.7
    ce_class_weight = jnp.array([1.0, 0.5], jnp.float32)            # from the module's __init__

    ref = sacofa_loss_ref(fc_weight, features, y, target, covariance, ratio, ce_class_weight)
    ref = jax.block_until_ready(ref)

    # Default tiling (single A tile at this size) and a forced two-tile run to
    # exercise the streamed CV accumulation path.
    for ta in (512, 128):
        loss = sacofa_loss(fc_weight, features, y, target, covariance, ratio,
                           ce_class_weight, tile_a=ta)
        loss = jax.block_until_ready(loss)
        assert np.allclose(np.asarray(loss), np.asarray(ref), rtol=2e-3, atol=2e-4), (
            ta, float(loss), float(ref))

    print("KERNEL_OK")
</pallas_src>

<mosaic_0001>
module attributes {stable_mosaic.version = 11 : i64} {
  func.func @_sigma2_kernel(%arg0: i32, %arg1: i32, %arg2: memref<1x256xf32, #tpu.memory_space<vmem>>, %arg3: memref<1x256xf32, #tpu.memory_space<vmem>>, %arg4: memref<1x256x256xf32, #tpu.memory_space<vmem>>, %arg5: memref<8x128xf32, #tpu.memory_space<vmem>>, %arg6: memref<1x1xf32, #tpu.memory_space<vmem>>) attributes {dimension_semantics = [#tpu.dimension_semantics<parallel>, #tpu.dimension_semantics<arbitrary>], iteration_bounds = array<i64: 2, 1>, scalar_prefetch = 0 : i64, scratch_operands = 1 : i64, tpu.core_type = #tpu.core_type<tc>, window_params = [{transform_indices = @transform_0, window_bounds = array<i64: 1, 256>}, {pipeline_mode = #tpu.pipeline_mode<synchronous>, transform_indices = @transform_1, window_bounds = array<i64: 1, 256>}, {transform_indices = @transform_2, window_bounds = array<i64: 1, 256, 256>}, {transform_indices = @transform_3, window_bounds = array<i64: 8, 128>}]} {
    %c0_i32 = arith.constant 0 : i32
    %0 = arith.cmpi eq, %arg1, %c0_i32 : i32
    %1 = arith.extui %0 : i1 to i32
    %c0_i32_0 = arith.constant 0 : i32
    %2 = arith.cmpi ne, %1, %c0_i32_0 : i32
    scf.if %2 {
      %cst_14 = arith.constant 0.000000e+00 : f32
      %17 = vector.broadcast %cst_14 : f32 to vector<1x1xf32>
      %c0_15 = arith.constant 0 : index
      %c0_16 = arith.constant 0 : index
      %18 = vector.load %arg6[%c0_15, %c0_16] : memref<1x1xf32, #tpu.memory_space<vmem>>, vector<1x1xf32>
      tpu.vector_store %arg6[%c0_15, %c0_16], %17 {strides = array<i32>} : memref<1x1xf32, #tpu.memory_space<vmem>>, vector<1x1xf32>,
    } else {
    }
    %c0 = arith.constant 0 : index
    %c0_1 = arith.constant 0 : index
    %3 = vector.load %arg2[%c0, %c0_1] : memref<1x256xf32, #tpu.memory_space<vmem>>, vector<1x256xf32>
    %c0_2 = arith.constant 0 : index
    %c0_3 = arith.constant 0 : index
    %c0_4 = arith.constant 0 : index
    %4 = vector.load %arg4[%c0_2, %c0_3, %c0_4] : memref<1x256x256xf32, #tpu.memory_space<vmem>>, vector<1x256x256xf32>
    %5 = vector.shape_cast %4 : vector<1x256x256xf32> to vector<256x256xf32>
    %cst = arith.constant dense<0.000000e+00> : vector<1x256xf32>
    %6 = tpu.matmul %3, %5, %cst {dimension_numbers = #tpu.dot_dimension_numbers<[1], [0], [0], [1], [0, 0, 1, 1], [], []>} : vector<1x256xf32>, vector<256x256xf32>, vector<1x256xf32> -> vector<1x256xf32>
    %c0_5 = arith.constant 0 : index
    %c0_6 = arith.constant 0 : index
    %7 = vector.load %arg3[%c0_5, %c0_6] : memref<1x256xf32, #tpu.memory_space<vmem>>, vector<1x256xf32>
    %c0_7 = arith.constant 0 : index
    %c0_8 = arith.constant 0 : index
    %8 = vector.load %arg6[%c0_7, %c0_8] : memref<1x1xf32, #tpu.memory_space<vmem>>, vector<1x1xf32>
    %9 = arith.mulf %6, %7 : vector<1x256xf32>
    %cst_9 = arith.constant dense<0.000000e+00> : vector<1xf32>
    %10 = vector.multi_reduction <add>, %9, %cst_9 [1] : vector<1x256xf32> to vector<1xf32>
    %11 = vector.shape_cast %10 : vector<1xf32> to vector<1x1xf32>
    %12 = arith.addf %8, %11 : vector<1x1xf32>
    %c0_10 = arith.constant 0 : index
    %c0_11 = arith.constant 0 : index
    %13 = vector.load %arg6[%c0_10, %c0_11] : memref<1x1xf32, #tpu.memory_space<vmem>>, vector<1x1xf32>
    tpu.vector_store %arg6[%c0_10, %c0_11], %12 {strides = array<i32>} : memref<1x1xf32, #tpu.memory_space<vmem>>, vector<1x1xf32>,
    %c0_i32_12 = arith.constant 0 : i32
    %14 = arith.cmpi eq, %arg1, %c0_i32_12 : i32
    %15 = arith.extui %14 : i1 to i32
    %c0_i32_13 = arith.constant 0 : i32
    %16 = arith.cmpi ne, %15, %c0_i32_13 : i32
    scf.if %16 {
      %c0_14 = arith.constant 0 : index
      %c0_15 = arith.constant 0 : index
      %17 = vector.load %arg6[%c0_14, %c0_15] : memref<1x1xf32, #tpu.memory_space<vmem>>, vector<1x1xf32>
      %18 = vector.shape_cast %17 : vector<1x1xf32> to vector<1x1xf32>
      %19 = vector.broadcast %18 : vector<1x1xf32> to vector<8x128xf32>
      %c0_16 = arith.constant 0 : index
      %c0_17 = arith.constant 0 : index
      %20 = vector.load %arg5[%c0_16, %c0_17] : memref<8x128xf32, #tpu.memory_space<vmem>>, vector<8x128xf32>
      tpu.vector_store %arg5[%c0_16, %c0_17], %19 {strides = array<i32>} : memref<8x128xf32, #tpu.memory_space<vmem>>, vector<8x128xf32>,
    } else {
    }
    return
  }
  func.func @transform_0(%arg0: i32, %arg1: i32) -> (i32, i32) {
    %c0_i32 = arith.constant 0 : i32
    %c0_i32_0 = arith.constant 0 : i32
    return %c0_i32, %arg1 : i32, i32
  }
  func.func @transform_1(%arg0: i32, %arg1: i32) -> (i32, i32) {
    %c0_i32 = arith.constant 0 : i32
    %c0_i32_0 = arith.constant 0 : i32
    %c0_i32_1 = arith.constant 0 : i32
    return %c0_i32, %c0_i32_0 : i32, i32
  }
  func.func @transform_2(%arg0: i32, %arg1: i32) -> (i32, i32, i32) {
    %c0_i32 = arith.constant 0 : i32
    %c0_i32_0 = arith.constant 0 : i32
    return %arg0, %arg1, %c0_i32 : i32, i32, i32
  }
  func.func @transform_3(%arg0: i32, %arg1: i32) -> (i32, i32) {
    %c0_i32 = arith.constant 0 : i32
    %c0_i32_0 = arith.constant 0 : i32
    return %arg0, %c0_i32 : i32, i32
  }
}

</mosaic_0001>

<bundles_post_ra>
// kernel: tpu_custom_call.1
= control target key start
LH: loop header
LB: loop body
LE: loop exit
PB: predicated region body
PF: predicated region fallthrough
CT: control target
= control target key end

     0   :  { %8 = vsyncpa [#allocation4], 0  ;;  %s1165_s0 = inlined_call_operand.hbm [shape: f32[1,256], index: 0, kind: input, shape index: {}]   ;;  %s1166_s1 = inlined_call_operand.vmem [shape: f32[1,256], index: 1, kind: input, shape index: {}]   ;;  %s1167_s2 = inlined_call_operand.hbm [shape: f32[2,256,256], index: 2, kind: input, shape index: {}]   ;;  %s1168_s3 = inlined_call_operand.hbm [shape: f32[16,128], index: 3, kind: output, shape index: {}]  }
   0x1   :  { %9 = vsyncpa [#allocation7], 0 }
   0x2   :  { %11 = vsyncpa [#allocation7 + $0x1], 0 }
   0x3   :  { %12 = vsyncpa [#allocation5], 0 }
   0x4   :  { %14 = vsyncpa [#allocation5 + $0x1], 0  ;;  %s862_s12 = smov 0   ;;  %s864_s13 = smov 0  }
   0x5   :  { %s866_s14 = smov 0   ;;  %s868_s15 = smov 0  }
   0x6   :  { %s870_s16 = smov 0   ;;  %s872_s17 = smov 0  }
   0x7 LB: > { %s529_s18 = sadd.s32 4294967295, %s833_s17   ;;  %s530_s19 = sadd.s32 4294967294, %s833_s17   ;;  %s833_s17 = sphi %s872_s17, %s20_s17   ;;  %s829_s16 = sphi %s870_s16, %s1196_s16   ;;  %s825_s15 = sphi %s868_s15, %s1195_s15   ;;  %s821_s14 = sphi %s866_s14, %s1194_s14   ;;  %s817_s13 = sphi %s864_s13, %s1193_s13   ;;  %s813_s12 = sphi %s862_s12, %s1192_s12  }
   0x8   : > { %s88_s20 = sadd.s32 1, %s821_s14  ;;  %p95_p0 = scmp.ne.s32.totalorder %s821_s14, %s817_s13 }
   0x9   : > { %p96_p1 = scmp.eq.s32.totalorder %s833_s17, 0  ;;  %p101_p2 = scmp.ne.s32.totalorder %s817_s13, %s813_s12 }
   0xa   : > { %p900_p3 = scmp.eq.s32.totalorder %s529_s18, 0  ;;  %p125_p4 = scmp.eq.s32.totalorder %s529_s18, 1 }
   0xb   : > { %p904_p5 = por %p96_p1, %p95_p0  ;;  %p131_p6 = scmp.eq.s32.totalorder %s530_s19, 1 }
   0xc   : > { %s1175_s21 = scalar_select %p900_p3, 1, 0 }
   0xd   : > { %p910_p7 = por %p900_p3, %p101_p2  ;;  %p914_p8 = por %p125_p4, %p95_p0 }
   0xe   : > { %p918_p9 = por %p131_p6, %p101_p2  ;;  %p531_p10 = scmp.ge.s32.totalorder %s833_s17, 1 }
   0xf   : > { %s1177_s23 = scalar_select %p910_p7, 1, 0 }
  0x10   : > { %s1178_s24 = scalar_select %p914_p8, 1, 0 }
  0x11   : > { %s1179_s25 = scalar_select %p918_p9, 1, 0 }
  0x12   : > { %p138_p11 = scmp.lt.s32.totalorder %s833_s17, 3  ;;  %s835_s27 = smov [#allocation3]  }
  0x13   : > { %s154_s28 = sshll.u32 %s835_s27, 4  ;;  %p632_p1 = scmp.lt.s32.totalorder %s833_s17, 2  ;;  %s155_s28 = int_to_ptr.vmem [resolvable:$true] %s154_s28 }
  0x14   : > { %p925_p13 = pnand %p531_p10, %p138_p11  ;;  %s32_s4 = sadd.s32 1, %s829_s16 }
  0x15   : > { %p934_p4 = pnand %p632_p1, %p904_p5  ;;  %p945_p6 = scmp.ge.s32.totalorder %s32_s4, 2 }
  0x16   : > { %s1180_s26 = scalar_select %p925_p13, 1, 0 }
  0x17   : > { %p619_p0 = pneg %p925_p13  ;;  %s168_s6 = sand.u32 1, %s821_s14  }
  0x18   : > { %s1181_s29 = scalar_select %p934_p4, 1, 0 }
  0x19   : > { %p940_p2 = pnand %p619_p0, %p900_p3  ;;  %s689_s9 = scalar_lea.hbm %s1165_s0, 32 }
  0x1a   : > { %s1183_s5 = scalar_select %p945_p6, 1, 0 }
  0x1b   : > { %p690_p5 = scmp.ne.s32.totalorder %s1165_s0, %s689_s9  ;;  %p691_p10 = pneg %p940_p2 }
  0x1c   : > { %p696_p0 = scmp.lt.u32.totalorder %s689_s9, %s1165_s0 }
  0x1d   : > { %p692_p11 = pnand %p691_p10, %p690_p5 }
  0x1f   : > { %p693_p1 = pneg %p692_p11 }
  0x21   : > { %p698_p12 = pnand %p696_p0, %p693_p1 }
  0x23   : > { %701 = shalt.err (!%p698_p12)
}
  0x24   : > { %s702_s22 = scalar_lea.vmem %s155_s28, 32  ;;  %p710_p3 = scmp.lt.s32.totalorder %s155_s28, %s155_s28 }
  0x25   : > { %p703_p9 = scmp.ne.s32.totalorder %s155_s28, %s702_s22  ;;  %p711_p13 = scmp.lt.s32.totalorder %s702_s22, %s702_s22 }
  0x27   : > { %p705_p8 = pnand %p703_p9, %p691_p10  ;;  %p712_p4 = por %p711_p13, %p710_p3 }
  0x29   : > { %p706_p7 = pneg %p705_p8 }
  0x2b   : > { %p713_p6 = pnand %p712_p4, %p706_p7 }
  0x2d   : > { %716 = shalt.err (!%p713_p6)
}
  0x2e   : > { %622 = dma.hbm_to_vmem [thread:$0]  (!%p940_p2), %s1165_s0, 32, %s155_s28, [#allocation4]  }
  0x2f   : > { %p1184_p9 = scmp.ne.s32.totalorder %s1183_s5, 0  ;;  %s534_s8 = sshll.u32 %s168_s6, 9 }
  0x30   : > { %s546_s10 = sshll.u32 %s829_s16, 13  ;;  %s172_s19 = scalar_lea.vmem [#allocation6], %s534_s8 }
  0x31   : > { %s1198_s4 = smov (%p1184_p9, %s32_s4), 0  ;;  %s976_s18 = scalar_lea.hbm %s1167_s2, %s546_s10 }
  0x32   : > { %s83_s9 = ssub.s32 %s829_s16, %s1198_s4  ;;  %s182_s22 = sshll.u32 %s172_s19, 4  ;;  %s983_s22 = int_to_ptr.vmem [resolvable:$true] %s182_s22 }
  0x33   : > { %p86_p3 = scmp.eq.s32.totalorder %s83_s9, 0  ;;  %s985_s5 = scalar_lea.sflag [#allocation7], %s168_s6 }
  0x34   : > { %s717_s27 = scalar_lea.hbm %s976_s18, 8192  ;;  %p1185_p8 = scmp.ne.s32.totalorder %s1181_s29, 0 }
  0x35   : > { %s981_s28 = scalar_select %p86_p3, %s821_s14, %s88_s20  }
  0x36   : > { %p718_p7 = scmp.ne.s32.totalorder %s976_s18, %s717_s27  ;;  %p719_p12 = pneg %p1185_p8 }
  0x37   : > { %s722_s8 = scalar_lea.hbm %s1167_s2, 16384  ;;  %p723_p2 = scmp.lt.u32.totalorder %s976_s18, %s1167_s2 }
  0x38   : > { %p720_p13 = pnand %p719_p12, %p718_p7  ;;  %p724_p6 = scmp.lt.u32.totalorder %s722_s8, %s717_s27 }
  0x39   : > { %p726_p10 = scmp.lt.u32.totalorder %s717_s27, %s976_s18 }
  0x3a   : > { %p721_p4 = pneg %p720_p13  ;;  %p725_p5 = por %p724_p6, %p723_p2 }
  0x3c   : > { %p727_p11 = por %p726_p10, %p725_p5 }
  0x3e   : > { %p728_p1 = pnand %p727_p11, %p721_p4 }
  0x40   : > { %731 = shalt.err (!%p728_p1)
}
  0x41   : > { %s732_s20 = scalar_lea.vmem %s983_s22, 8192  ;;  %s836_s6 = smov [#allocation6]  }
  0x42   : > { %p733_p0 = scmp.ne.s32.totalorder %s983_s22, %s732_s20  ;;  %s737_s11 = sshll.u32 %s836_s6, 4  ;;  %s738_s11 = int_to_ptr.vmem [resolvable:$false] %s737_s11 }
  0x43   : > { %s739_s19 = scalar_lea.vmem %s738_s11, 16384  ;;  %p740_p7 = scmp.lt.s32.totalorder %s983_s22, %s738_s11 }
  0x44   : > { %p735_p9 = pnand %p733_p0, %p719_p12  ;;  %p741_p13 = scmp.lt.s32.totalorder %s739_s19, %s732_s20 }
  0x46   : > { %p736_p3 = pneg %p735_p9  ;;  %p742_p2 = por %p741_p13, %p740_p7 }
  0x48   : > { %p743_p6 = pnand %p742_p2, %p736_p3 }
  0x4a   : > { %746 = shalt.err (!%p743_p6)
}
  0x4b   : > { %s837_s27 = smov 256   ;;  %s838_s7 = smov 16  }
  0x4c   : > { %626 = dma.hbm_to_vmem [thread:$0]  (!%p1185_p8), %s976_s18, 8192, %s983_s22, %s985_s5, %s837_s27, %s837_s27, %s838_s7  }
  0x4d   : > { %p1186_p12 = scmp.ne.s32.totalorder %s1180_s26, 0 }
  0x4e   : > { %p1187_p4 = scmp.ne.s32.totalorder (!%p1186_p12), %s1175_s21, 0 }
  0x4f   : > { %194 = sbr.rel (%p1186_p12) target bundleno = 670 (0x29e), region = 32 }
  0x56   : > { %800 = dma.done.wait (%p1187_p4), [#allocation4], 32  }
  0x57   : > { %802 = vsyncadd (%p1187_p4), [#allocation4], 4294967264  ;;  %s1020_s9 = sand.u32 1, %s817_s13   ;;  %p1188_p8 = scmp.ne.s32.totalorder %s1177_s23, 0 }
  0x58   : > { %s539_s8 = sshll.u32 %s1020_s9, 9  ;;  %s201_s10 = scalar_lea.sflag [#allocation7], %s1020_s9 }
  0x59   : > { %s1024_s30 = scalar_lea.vmem [#allocation6], %s539_s8 }
  0x5a   : > { %804 = dma.done.wait (%p1188_p8), %s201_s10, 8192  }
  0x5b   : > { %806 = vsyncadd (%p1188_p8), %s201_s10, 4294959104  ;;  %v237_v0 = vld [vmem:[%s1024_s30 + $0x8] sm:$0xff]  ;;  %v239_v1 = vld [vmem:[%s1024_s30 + $0x18] sm:$0xff]  ;;  %v301_v25 = vlaneseq  ;;  %vm233_vm0 = vcmask 0   ;;  %vm397_vm1 = vcmask 1040384   ;;  %s540_s26 = sshll.u32 %s1020_s9, 3 }
  0x5c   : > { %v236_v2 = vld [vmem:[%s1024_s30] sm:$0xff]  ;;  %v547_v3 = vpack.c.bf16 %v239_v1, %v237_v0  ;;  %v238_v4 = vld [vmem:[%s1024_s30 + $0x10] sm:$0xff]  ;;  %v241_v5 = vld [vmem:[%s1024_s30 + $0x28] sm:$0xff]  ;;  %s226_s29 = scalar_lea.vmem [#allocation8], %s540_s26  ;;  %s543_s22 = sshll.u32 %s825_s15, 7 }
  0x5d   : > { %v243_v6 = vld [vmem:[%s1024_s30 + $0x38] sm:$0xff]  ;;  %v549_v7 = vpack.c.bf16 %v238_v4, %v236_v2  ;;  %v240_v9 = vld [vmem:[%s1024_s30 + $0x20] sm:$0xff]  ;;  %v242_v10 = vld [vmem:[%s1024_s30 + $0x30] sm:$0xff]  ;;  %v1052_v32 = vshrl.u32 %v301_v25, 7  ;;  %s434_s18 = sshll.u32 %s226_s29, 4  ;;  %s1118_s6 = scalar_lea.hbm %s1168_s3, %s543_s22  ;;  %s1113_s18 = int_to_ptr.vmem [resolvable:$true] %s434_s18 }
  0x5e   : > { %v551_v8 = vpack.c.bf16 %v243_v6, %v241_v5  ;;  %v245_v11 = vld [vmem:[%s1024_s30 + $0x48] sm:$0xff]  ;;  %548 = vmatprep.subr.bf16.mxu0 %v547_v3  ;;  %v247_v12 = vld [vmem:[%s1024_s30 + $0x58] sm:$0xff]  ;;  %v553_v13 = vpack.c.bf16 %v242_v10, %v240_v9  ;;  %v244_v15 = vld [vmem:[%s1024_s30 + $0x40] sm:$0xff]  ;;  %s421_s11 = scalar_lea.sflag [#allocation5], %s1020_s9  ;;  %s747_s19 = scalar_lea.vmem %s1113_s18, 128 }
  0x5f   : > { %550 = vmatpush1.bf16.msra.mxu0 %v549_v7  ;;  %v555_v14 = vpack.c.bf16 %v247_v12, %v245_v11  ;;  %v246_v16 = vld [vmem:[%s1024_s30 + $0x50] sm:$0xff]  ;;  %v249_v17 = vld [vmem:[%s1024_s30 + $0x68] sm:$0xff]  ;;  %v251_v18 = vld [vmem:[%s1024_s30 + $0x78] sm:$0xff]  ;;  %v307_v39 = vsub.s32 1, %v1052_v32  ;;  %p748_p5 = scmp.ne.s32.totalorder %s1113_s18, %s747_s19  ;;  %p1189_p10 = scmp.ne.s32.totalorder %s1178_s24, 0 }
  0x60   : > { %552 = vmatprep.subr.bf16.mxu0 %v551_v8  ;;  %v557_v19 = vpack.c.bf16 %v246_v16, %v244_v15  ;;  %v559_v20 = vpack.c.bf16 %v251_v18, %v249_v17  ;;  %v248_v21 = vld [vmem:[%s1024_s30 + $0x60] sm:$0xff]  ;;  %v250_v22 = vld [vmem:[%s1024_s30 + $0x70] sm:$0xff]  ;;  %v253_v23 = vld [vmem:[%s1024_s30 + $0x88] sm:$0xff]  ;;  %s841_s27 = smov [#allocation8]  }
  0x61   : > { %v255_v24 = vld [vmem:[%s1024_s30 + $0x98] sm:$0xff]  ;;  %v561_v26 = vpack.c.bf16 %v250_v22, %v248_v21  ;;  %v252_v28 = vld [vmem:[%s1024_s30 + $0x80] sm:$0xff]  ;;  %v254_v29 = vld [vmem:[%s1024_s30 + $0x90] sm:$0xff]  ;;  %p749_p11 = pnand %p748_p5, %p1189_p10  ;;  %s751_s15 = sshll.u32 %s841_s27, 4  ;;  %s752_s15 = int_to_ptr.vmem [resolvable:$false] %s751_s15 }
  0x62   : > { %v563_v27 = vpack.c.bf16 %v255_v24, %v253_v23  ;;  %v257_v30 = vld [vmem:[%s1024_s30 + $0xa8] sm:$0xff]  ;;  %v259_v31 = vld [vmem:[%s1024_s30 + $0xb8] sm:$0xff]  ;;  %v565_v33 = vpack.c.bf16 %v254_v29, %v252_v28  ;;  %v256_v35 = vld [vmem:[%s1024_s30 + $0xa0] sm:$0xff]  ;;  %s753_s7 = scalar_lea.vmem %s752_s15, 256  ;;  %p754_p0 = scmp.lt.s32.totalorder %s1113_s18, %s752_s15 }
  0x63   : > { %554 = vmatpush1.bf16.msra.mxu0 %v553_v13  ;;  %v567_v34 = vpack.c.bf16 %v259_v31, %v257_v30  ;;  %v258_v36 = vld [vmem:[%s1024_s30 + $0xb0] sm:$0xff]  ;;  %v261_v37 = vld [vmem:[%s1024_s30 + $0xc8] sm:$0xff]  ;;  %v263_v38 = vld [vmem:[%s1024_s30 + $0xd8] sm:$0xff]  ;;  %p750_p1 = pneg %p749_p11  ;;  %p755_p9 = scmp.lt.s32.totalorder %s753_s7, %s747_s19 }
  0x64   : > { %556 = vmatprep.subr.bf16.mxu0 %v555_v14  ;;  %v569_v40 = vpack.c.bf16 %v258_v36, %v256_v35  ;;  %v571_v41 = vpack.c.bf16 %v263_v38, %v261_v37  ;;  %v260_v42 = vld [vmem:[%s1024_s30 + $0xc0] sm:$0xff]  ;;  %v262_v43 = vld [vmem:[%s1024_s30 + $0xd0] sm:$0xff]  ;;  %v1061_v44 = vld [vmem:[#allocation3] sm:$0x3]  ;;  %v303_v37 = vsub.s32 0, %v1052_v32 }
  0x65   : > { %v265_v45 = vld [vmem:[%s1024_s30 + $0xe8] sm:$0xff]  ;;  %v267_v46 = vld [vmem:[%s1024_s30 + $0xf8] sm:$0xff]  ;;  %v308_v47 = vrot.slane %v1061_v44, %v307_v39  ;;  %v573_v48 = vpack.c.bf16 %v262_v43, %v260_v42  ;;  %v264_v50 = vld [vmem:[%s1024_s30 + $0xe0] sm:$0xff]  ;;  %p756_p3 = por %p755_p9, %p754_p0 }
  0x66   : > { %v575_v49 = vpack.c.bf16 %v267_v46, %v265_v45  ;;  %v266_v51 = vld [vmem:[%s1024_s30 + $0xf0] sm:$0xff]  ;;  %v269_v52 = vld [vmem:[%s1024_s30 + $0x108] sm:$0xff]  ;;  %v271_v53 = vld [vmem:[%s1024_s30 + $0x118] sm:$0xff] }
  0x67   : > { %558 = vmatpush1.bf16.msra.mxu0 %v557_v19  ;;  %375 = vmatprep.mubr.f32.mxu0 %v308_v47  ;;  %v577_v54 = vpack.c.bf16 %v266_v51, %v264_v50  ;;  %v579_v55 = vpack.c.bf16 %v271_v53, %v269_v52  ;;  %v268_v56 = vld [vmem:[%s1024_s30 + $0x100] sm:$0xff]  ;;  %v270_v57 = vld [vmem:[%s1024_s30 + $0x110] sm:$0xff]  ;;  %v273_v58 = vld [vmem:[%s1024_s30 + $0x128] sm:$0xff]  ;;  %v840_v52 = vmov 0   ;;  %p757_p7 = pnand %p756_p3, %p750_p1 }
  0x68   : > { %560 = vmatprep.subr.bf16.mxu0 %v559_v20  ;;  %v275_v59 = vld [vmem:[%s1024_s30 + $0x138] sm:$0xff]  ;;  %v581_v60 = vpack.c.bf16 %v270_v57, %v268_v56  ;;  %v272_v62 = vld [vmem:[%s1024_s30 + $0x120] sm:$0xff]  ;;  %v274_v63 = vld [vmem:[%s1024_s30 + $0x130] sm:$0xff]  ;;  %688 = vset.pattern.permute.xlu0 %v840_v52 }
  0x69   : > { %v583_v61 = vpack.c.bf16 %v275_v59, %v273_v58  ;;  %v277_v0 = vld [vmem:[%s1024_s30 + $0x148] sm:$0xff]  ;;  %v279_v1 = vld [vmem:[%s1024_s30 + $0x158] sm:$0xff]  ;;  %v585_v2 = vpack.c.bf16 %v274_v63, %v272_v62  ;;  %v276_v4 = vld [vmem:[%s1024_s30 + $0x140] sm:$0xff] }
  0x6a   : > { %v587_v3 = vpack.c.bf16 %v279_v1, %v277_v0  ;;  %v278_v5 = vld [vmem:[%s1024_s30 + $0x150] sm:$0xff]  ;;  %v281_v6 = vld [vmem:[%s1024_s30 + $0x168] sm:$0xff]  ;;  %v283_v7 = vld [vmem:[%s1024_s30 + $0x178] sm:$0xff] }
  0x6b   : > { %562 = vmatpush1.bf16.msra.mxu0 %v561_v26  ;;  %v589_v8 = vpack.c.bf16 %v278_v5, %v276_v4  ;;  %v591_v9 = vpack.c.bf16 %v283_v7, %v281_v6  ;;  %v280_v10 = vld [vmem:[%s1024_s30 + $0x160] sm:$0xff]  ;;  %v282_v11 = vld [vmem:[%s1024_s30 + $0x170] sm:$0xff]  ;;  %v285_v12 = vld [vmem:[%s1024_s30 + $0x188] sm:$0xff] }
  0x6c   : > { %564 = vmatprep.subr.bf16.mxu0 %v563_v27  ;;  %v287_v13 = vld [vmem:[%s1024_s30 + $0x198] sm:$0xff]  ;;  %v593_v14 = vpack.c.bf16 %v282_v11, %v280_v10  ;;  %v284_v16 = vld [vmem:[%s1024_s30 + $0x180] sm:$0xff]  ;;  %v286_v17 = vld [vmem:[%s1024_s30 + $0x190] sm:$0xff] }
  0x6d   : > { %v595_v15 = vpack.c.bf16 %v287_v13, %v285_v12  ;;  %v289_v18 = vld [vmem:[%s1024_s30 + $0x1a8] sm:$0xff]  ;;  %v291_v19 = vld [vmem:[%s1024_s30 + $0x1b8] sm:$0xff]  ;;  %v597_v20 = vpack.c.bf16 %v286_v17, %v284_v16  ;;  %v288_v22 = vld [vmem:[%s1024_s30 + $0x1a0] sm:$0xff] }
  0x6e   : > { %v599_v21 = vpack.c.bf16 %v291_v19, %v289_v18  ;;  %v290_v23 = vld [vmem:[%s1024_s30 + $0x1b0] sm:$0xff]  ;;  %v293_v24 = vld [vmem:[%s1024_s30 + $0x1c8] sm:$0xff]  ;;  %v295_v25 = vld [vmem:[%s1024_s30 + $0x1d8] sm:$0xff] }
  0x6f   : > { %566 = vmatpush1.bf16.msra.mxu0 %v565_v33  ;;  %v601_v26 = vpack.c.bf16 %v290_v23, %v288_v22  ;;  %v603_v27 = vpack.c.bf16 %v295_v25, %v293_v24  ;;  %v292_v28 = vld [vmem:[%s1024_s30 + $0x1c0] sm:$0xff]  ;;  %v294_v29 = vld [vmem:[%s1024_s30 + $0x1d0] sm:$0xff]  ;;  %v297_v30 = vld [vmem:[%s1024_s30 + $0x1e8] sm:$0xff] }
  0x70   : > { %568 = vmatprep.subr.bf16.mxu0 %v567_v34  ;;  %v299_v31 = vld [vmem:[%s1024_s30 + $0x1f8] sm:$0xff]  ;;  %v605_v33 = vpack.c.bf16 %v294_v29, %v292_v28  ;;  %v296_v35 = vld [vmem:[%s1024_s30 + $0x1e0] sm:$0xff]  ;;  %v298_v36 = vld [vmem:[%s1024_s30 + $0x1f0] sm:$0xff] }
  0x71   : > { %v607_v34 = vpack.c.bf16 %v299_v31, %v297_v30  ;;  %v609_v38 = vpack.c.bf16 %v298_v36, %v296_v35  ;;  %v382_v42 = vld [vmem:[%s1166_s1] sm:$0x3] }
  0x72   : > { %v388_v43 = vrot.slane %v382_v42, %v303_v37  ;;  %v392_v45 = vrot.slane %v382_v42, %v307_v39 }
  0x73   : > { %570 = vmatpush1.bf16.msra.mxu0 %v569_v40  ;;  %v304_v40 = vrot.slane %v1061_v44, %v303_v37 }
  0x74   : > { %572 = vmatprep.subr.bf16.mxu0 %v571_v41  ;;  %v839_v41 = vmov 0.0  }
  0x75   : > { %234 = vst.msk [vmem:[#allocation2] sm:$0x1] %vm233_vm0, %v839_v41 }
  0x77   : > { %574 = vmatpush1.bf16.msra.mxu0 %v573_v48 }
  0x78   : > { %576 = vmatprep.subr.bf16.mxu0 %v575_v49 }
  0x7b   : > { %578 = vmatpush1.bf16.msra.mxu0 %v577_v54 }
  0x7c   : > { %580 = vmatprep.subr.bf16.mxu0 %v579_v55  ;;  %v383_v53 = vld [vmem:[#allocation2] sm:$0x1] }
  0x7f   : > { %582 = vmatpush1.bf16.msra.mxu0 %v581_v60 }
  0x80   : > { %584 = vmatprep.subr.bf16.mxu0 %v583_v61 }
  0x83   : > { %586 = vmatpush1.bf16.msra.mxu0 %v585_v2 }
  0x84   : > { %588 = vmatprep.subr.bf16.mxu0 %v587_v3 }
  0x87   : > { %590 = vmatpush1.bf16.msra.mxu0 %v589_v8 }
  0x88   : > { %592 = vmatprep.subr.bf16.mxu0 %v591_v9 }
  0x8b   : > { %594 = vmatpush1.bf16.msra.mxu0 %v593_v14 }
  0x8c   : > { %596 = vmatprep.subr.bf16.mxu0 %v595_v15 }
  0x8f   : > { %598 = vmatpush1.bf16.msra.mxu0 %v597_v20 }
  0x90   : > { %600 = vmatprep.subr.bf16.mxu0 %v599_v21 }
  0x93   : > { %602 = vmatpush1.bf16.msra.mxu0 %v601_v26 }
  0x94   : > { %604 = vmatprep.subr.bf16.mxu0 %v603_v27 }
  0x97   : > { %606 = vmatpush1.bf16.msra.mxu0 %v605_v33 }
  0x98   : > { %608 = vmatprep.subr.bf16.mxu0 %v607_v34 }
  0x9b   : > { %610 = vmatpush1.bf16.msra.mxu0 %v609_v38 }
  0x9e   : > { %376 = vmatmul.mubr.f32.vlgmr.msra.gmra.mrb[0].mxu0 %v304_v40 }
 0x171   : > { %v377_v46 = vpop.f32.mrb[0].mxu0 }
 0x172   : > { %v395_v47 = vmul.f32 %v388_v43, %v377_v46  ;;  %v379_v48 = vpop.f32.mrb[1].mxu0 }
 0x173   : > { %v396_v44 = vmul.f32 %v392_v45, %v379_v48 }
 0x174   : > { %v398_v49 = vsel %vm397_vm1, %v395_v47, 0.0 }
 0x175   : > { %v399_v50 = vsel %vm397_vm1, %v396_v44, 0.0 }
 0x176   : > { %v400_v51 = vadd.f32 %v399_v50, %v398_v49 }
 0x178   : > { %401 = vadd.xlane.f32.xlu0 %v400_v51 }
 0x205   : > { %v402_v54 = vpop.xlane.xlu0 %401 }
 0x206   : > { %v403_v55 = vadd.f32 %v402_v54, %v383_v53 }
 0x208   : > { %405 = vst.msk [vmem:[#allocation2] sm:$0x1] %vm233_vm0, %v403_v55 }
 0x20f   : > { %v541_v32 = vld [vmem:[#allocation2] ss:$0 sm:$0xff] }
 0x210   : > { %416 = vperm.xlu0 %688, %v541_v32  }
 0x28f   : > { %v417_v39 = vpop.permute.xlu0 %416 }
 0x290   : > { %419 = vst [vmem:[%s226_s29] sm:$0xff] %v417_v39 }
 0x291   : > { %760 = shalt.err (!%p757_p7)
}
 0x292   : > { %s761_s9 = scalar_lea.hbm %s1118_s6, 128  ;;  %s765_s30 = scalar_lea.hbm %s1168_s3, 256 }
 0x293   : > { %p762_p13 = scmp.ne.s32.totalorder %s1118_s6, %s761_s9  ;;  %p766_p12 = scmp.lt.u32.totalorder %s1118_s6, %s1168_s3 }
 0x294   : > { %p767_p4 = scmp.lt.u32.totalorder %s765_s30, %s761_s9  ;;  %p769_p5 = scmp.lt.u32.totalorder %s761_s9, %s1118_s6 }
 0x295   : > { %p763_p2 = pnand %p762_p13, %p1189_p10 }
 0x296   : > { %p768_p8 = por %p767_p4, %p766_p12 }
 0x297   : > { %p764_p6 = pneg %p763_p2 }
 0x298   : > { %p770_p11 = por %p769_p5, %p768_p8 }
 0x29a   : > { %p771_p1 = pnand %p770_p11, %p764_p6 }
 0x29c   : > { %774 = shalt.err (!%p771_p1)
}
 0x29d   : > { %617 = dma.vmem_to_hbm [thread:$0]  (%p1189_p10), %s1113_s18, 128, %s1118_s6, %s421_s11  }
 0x29e PF: > { %s446_s26 = sand.u32 1, %s813_s12   ;;  %p1190_p0 = scmp.ne.s32.totalorder %s1179_s25, 0 }
 0x29f   : > { %p1191_p9 = scmp.ge.s32.totalorder %s833_s17, 2  ;;  %s447_s29 = scalar_lea.sflag [#allocation5], %s446_s26 }
 0x2a1   : > { %p628_p3 = pnand %p1191_p9, %p1190_p0 }
 0x2a3   : > { %808 = dma.done.wait (!%p628_p3), %s447_s29, 128  }
 0x2a4   : > { %810 = vsyncadd (!%p628_p3), %s447_s29, 4294967168  ;;  %s20_s17 = sadd.s32 1, %s833_s17   ;;  %s1192_s12 = smov %s817_s13 }
 0x2a5   : > { %p17_p7 = scmp.ge.s32.totalorder %s20_s17, 4   ;;  %s1193_s13 = smov %s821_s14 }
 0x2a6   : > { %s1194_s14 = smov %s981_s28  ;;  %s1195_s15 = smov %s829_s16 }
 0x2a7   : > { %s1196_s16 = smov %s1198_s4  ;;  %19 = sbr.rel (!%p17_p7) target bundleno = 7 (0x7), region = 91 }
 0x2ae   :  { %452 = vsyncpa [#allocation4], 1 }
 0x2af   :  { %454 = vsyncpa [#allocation4 + $0x1], 1 }
 0x2b0   :  { %455 = vsyncpa [#allocation7], 1 }
 0x2b1   :  { %457 = vsyncpa [#allocation7 + $0x1], 1 }
 0x2b2   :  { %458 = vsyncpa [#allocation5], 1 }
 0x2b3   :  { %460 = vsyncpa [#allocation5 + $0x1], 1 }

</bundles_post_ra>
